<compile_context>
chip_gen: v6e
topology: v6e:2x2x1
jax: 0.10.0
libtpu: 0.0.40
codegen_flags: <defaults>
</compile_context>

<pallas_src>
import jax
import jax.numpy as jnp
from jax import lax
from jax.experimental import pallas as pl
from jax.experimental.pallas import tpu as pltpu


_MAX_BATCH_TILE = 256      # max output rows gathered per grid step
_ONEHOT_MAX_N = 4096       # one-hot MXU path cap on table rows
_FALLBACK_INFLIGHT = 8     # concurrent row DMAs in the HBM-gather fallback


def _round_up(x: int, m: int) -> int:
    return ((x + m - 1) // m) * m


def _cdiv(a: int, b: int) -> int:
    return (a + b - 1) // b


def _vmem_capacity_bytes() -> int:
    try:
        return int(pltpu.get_tpu_info().vmem_capacity_bytes)
    except Exception:
        return 64 * 1024 * 1024  # conservative: v7x per-TensorCore VMEM


def _table_vmem_budget_bytes(vmem_cap: int) -> int:
    # Generation-aware budget for keeping the table resident (single copy):
    # ~24 MiB on v7x (64 MiB VMEM), capped at 48 MiB on v5e/v6e (128 MiB),
    # leaving headroom for double-buffered output blocks + compiler scratch.
    return min((vmem_cap * 3) // 8, 48 * 1024 * 1024)


def _pick_batch_tile(B: int) -> int:
    # Big tiles amortize the ~0.35 us per-grid-step cost, but keep ~4 grid
    # steps when B is large so v7x's two TensorCores both get work
    # (the batch axis is marked "parallel").  Always a multiple of 8.
    return min(_MAX_BATCH_TILE, max(8, _round_up(_cdiv(B, 4), 8)))


def _vmem_limit(vmem_cap: int, needed: int) -> int:
    # Never below the per-generation defaults (avoids v5e's 16 MiB default
    # scoped limit biting large tables), never above physical capacity.
    return int(min(vmem_cap - (2 << 20), max(needed + (8 << 20), 32 << 20)))


# ---------------------------------------------------------------------------
# Fast path 1: table resident in VMEM, one-hot MXU matmul gather per tile.
# ---------------------------------------------------------------------------
def _onehot_gather_kernel(idx_ref, table_ref, out_ref):
    # idx_ref:   (tb, 1)  int32 block in VMEM
    # table_ref: (N, D)   whole table, single copy resident in VMEM
    # out_ref:   (tb, D)  lane-dense output block
    tb = out_ref.shape[0]
    n = table_ref.shape[0]
    idx = idx_ref[...]                                     # (tb, 1) int32
    col = lax.broadcasted_iota(jnp.int32, (tb, n), 1)      # (tb, N)
    onehot = (col == idx).astype(table_ref.dtype)          # (tb, N), 0/1
    # One MXU matmul gathers all tb rows and is stored as one unmasked
    # lane-dense tile.  Exact for 16-bit tables (single non-zero product,
    # f32 accumulation); f32 tables inherit TPU f32 matmul precision.
    gathered = jnp.dot(onehot, table_ref[...],
                       preferred_element_type=jnp.float32)
    out_ref[...] = gathered.astype(out_ref.dtype)


def _gather_onehot_resident(idx2d, table, b_pad, tb, N, D, vmem_cap):
    itemsize = table.dtype.itemsize
    needed = (N * D * itemsize                 # single-buffered table
              + 2 * tb * D * itemsize          # double-buffered output blocks
              + 2 * tb * 128 * 4               # (tb,1) int32 blocks (lane pad)
              + tb * max(N, 128) * max(itemsize, 4))  # one-hot temporary
    return pl.pallas_call(
        _onehot_gather_kernel,
        out_shape=jax.ShapeDtypeStruct((b_pad, D), table.dtype),
        grid=(b_pad // tb,),
        in_specs=[
            pl.BlockSpec((tb, 1), lambda i: (i, 0)),
            # Whole table, one VMEM-resident copy; no pipeline double-buffer.
            pl.BlockSpec(memory_space=pltpu.MemorySpace.VMEM),
        ],
        out_specs=pl.BlockSpec((tb, D), lambda i: (i, 0)),
        compiler_params=pltpu.CompilerParams(
            dimension_semantics=("parallel",),
            vmem_limit_bytes=_vmem_limit(vmem_cap, needed),
        ),
        cost_estimate=pl.CostEstimate(
            flops=2 * b_pad * N * D,
            transcendentals=0,
            bytes_accessed=int(N * D * itemsize + b_pad * D * itemsize
                               + b_pad * 4)),
    )(idx2d, table)


# ---------------------------------------------------------------------------
# Fast path 2: table resident in VMEM, N too large for one-hot -> unrolled
# row-copy loop (indices scalar-prefetched into SMEM).
# ---------------------------------------------------------------------------
def _loop_gather_kernel(idx_ref, table_ref, out_ref):
    # idx_ref:   (b_pad,) int32 in SMEM (scalar prefetch)
    # table_ref: (N, D)   whole table resident in VMEM
    # out_ref:   (tb, D)  output block
    tb = out_ref.shape[0]
    base = pl.program_id(0) * tb

    def body(r, carry):
        row = idx_ref[base + r]
        out_ref[pl.ds(r, 1), :] = table_ref[pl.ds(row, 1), :]
        return carry

    lax.fori_loop(0, tb, body, 0, unroll=8)


def _gather_loop_resident(idx, table, b_pad, tb, N, D, vmem_cap):
    itemsize = table.dtype.itemsize
    needed = N * D * itemsize + 2 * tb * D * itemsize
    return pl.pallas_call(
        _loop_gather_kernel,
        out_shape=jax.ShapeDtypeStruct((b_pad, D), table.dtype),
        grid_spec=pltpu.PrefetchScalarGridSpec(
            num_scalar_prefetch=1,
            grid=(b_pad // tb,),
            in_specs=[pl.BlockSpec(memory_space=pltpu.MemorySpace.VMEM)],
            out_specs=pl.BlockSpec((tb, D), lambda i, idx_ref: (i, 0)),
        ),
        compiler_params=pltpu.CompilerParams(
            dimension_semantics=("parallel",),
            vmem_limit_bytes=_vmem_limit(vmem_cap, needed),
        ),
        cost_estimate=pl.CostEstimate(
            flops=0, transcendentals=0,
            bytes_accessed=int(N * D * itemsize + b_pad * D * itemsize
                               + b_pad * 4)),
    )(idx, table)


# ---------------------------------------------------------------------------
# Fallback: table does not fit VMEM -> manual in-flight row DMAs from HBM
# straight into the lane-dense output block (batched per grid step).
# ---------------------------------------------------------------------------
def _make_dma_gather_kernel(tb: int, inflight: int):
    def kernel(idx_ref, w_hbm, out_ref, sems):
        # idx_ref: (b_pad,) int32 in SMEM; w_hbm: (N, D) in HBM (pl.ANY)
        # out_ref: (tb, D) VMEM output block; sems: (inflight,) DMA semaphores
        base = pl.program_id(0) * tb

        def row_copy(r):
            row = idx_ref[base + r]
            return pltpu.make_async_copy(
                w_hbm.at[pl.ds(row, 1), :],
                out_ref.at[pl.ds(r, 1), :],
                sems.at[r % inflight])

        @pl.loop(0, inflight)
        def _(r):
            row_copy(r).start()

        @pl.loop(0, tb)
        def _(r):
            row_copy(r).wait()

            @pl.when(r + inflight < tb)
            def _():
                row_copy(r + inflight).start()

    return kernel


def _gather_dma_fallback(idx, weight, b_pad, tb, N, D):
    inflight = min(_FALLBACK_INFLIGHT, tb)
    itemsize = weight.dtype.itemsize
    return pl.pallas_call(
        _make_dma_gather_kernel(tb, inflight),
        out_shape=jax.ShapeDtypeStruct((b_pad, D), weight.dtype),
        grid_spec=pltpu.PrefetchScalarGridSpec(
            num_scalar_prefetch=1,
            grid=(b_pad // tb,),
            in_specs=[pl.BlockSpec(memory_space=pl.ANY)],
            out_specs=pl.BlockSpec((tb, D), lambda i, idx_ref: (i, 0)),
            scratch_shapes=[pltpu.SemaphoreType.DMA((inflight,))],
        ),
        compiler_params=pltpu.CompilerParams(
            dimension_semantics=("arbitrary",),
        ),
        cost_estimate=pl.CostEstimate(
            flops=0, transcendentals=0,
            bytes_accessed=int(2 * b_pad * D * itemsize + b_pad * 4)),
    )(idx, weight)


# ---------------------------------------------------------------------------
# Public forward.
# ---------------------------------------------------------------------------
def embedding_net_forward(indices: jax.Array, weight: jax.Array, shape) -> jax.Array:
    """Pallas implementation of EmbeddingNet.forward.

    Args:
        indices: (B,) integer indices.
        weight:  (num_embeddings, H*W) embedding table (lane-dense layout).
        shape:   (H, W) tuple.

    Returns:
        (B, 1, H, W) embeddings with weight's dtype.
    """
    H, W = shape
    D = H * W
    B = int(indices.shape[0])
    N = int(weight.shape[0])
    assert weight.shape == (N, D), "weight must be (num_embeddings, H*W)"

    # Clamp indices: dynamic VMEM/HBM reads in-kernel are not bounds-checked.
    # (torch nn.Embedding would raise on OOB; here OOB indices are clamped.)
    idx = jnp.clip(indices.astype(jnp.int32), 0, N - 1)

    tb = _pick_batch_tile(B)
    b_pad = _round_up(B, tb)
    if b_pad != B:
        # Padded rows gather row 0 (always in range) and are sliced off below.
        idx = jnp.pad(idx, (0, b_pad - B))

    vmem_cap = _vmem_capacity_bytes()
    table_bytes = N * D * weight.dtype.itemsize

    if table_bytes <= _table_vmem_budget_bytes(vmem_cap):
        if N <= _ONEHOT_MAX_N:
            out2d = _gather_onehot_resident(idx.reshape(b_pad, 1), weight,
                                            b_pad, tb, N, D, vmem_cap)
        else:
            out2d = _gather_loop_resident(idx, weight, b_pad, tb, N, D, vmem_cap)
    else:
        out2d = _gather_dma_fallback(idx, weight, b_pad, tb, N, D)

    if b_pad != B:
        out2d = out2d[:B]

    # view(-1, 1, H, W)
    return out2d.reshape(B, 1, H, W)


def make_embedding_params(key, num_embeddings: int, shape, pad_idx=None):
    """Deterministic nn.Embedding-style init: N(0,1), pad row zeroed."""
    H, W = shape
    embedding_dim = H * W
    weight = jax.random.normal(key, (num_embeddings, embedding_dim),
                               dtype=jnp.float32)
    if pad_idx is not None:
        weight = weight.at[pad_idx].set(0.0)
    return weight


if __name__ == "__main__":
    key = jax.random.PRNGKey(0)
    k_w, k_idx = jax.random.split(key)

    num_embeddings = 10
    shape = (16, 16)          # -> embedding_dim = 256
    pad_idx = 0
    batch_size = 4

    indices = jax.random.randint(k_idx, (batch_size,), 0, num_embeddings,
                                 dtype=jnp.int32)

    # float32 table (faithful to the PyTorch nn.Embedding default).
    w_f32 = make_embedding_params(k_w, num_embeddings, shape, pad_idx=pad_idx)
    out_f32 = jax.block_until_ready(embedding_net_forward(indices, w_f32, shape))
    ref_f32 = w_f32[indices].reshape(batch_size, 1, *shape)
    assert out_f32.shape == (batch_size, 1, shape[0], shape[1])
    # f32 values route through the MXU one-hot matmul; tolerance covers the
    # TPU's reduced-precision f32 matmul modes (worst case ~2e-3 relative).
    assert jnp.allclose(out_f32, ref_f32, rtol=5e-3, atol=2e-3), \
        "mismatch vs reference embedding lookup (f32)"

    # bfloat16 table (review suggestion: halves HBM/VMEM traffic).  The
    # one-hot gather is bit-exact for 16-bit tables.
    w_bf16 = w_f32.astype(jnp.bfloat16)
    out_bf16 = jax.block_until_ready(embedding_net_forward(indices, w_bf16, shape))
    ref_bf16 = w_bf16[indices].reshape(batch_size, 1, *shape)
    assert jnp.allclose(out_bf16.astype(jnp.float32),
                        ref_bf16.astype(jnp.float32)), \
        "mismatch vs reference embedding lookup (bf16)"

    print("KERNEL_OK")
</pallas_src>

<mosaic_0001>
module attributes {stable_mosaic.version = 11 : i64} {
  func.func @_onehot_gather_kernel(%arg0: i32, %arg1: memref<8x1xi32, #tpu.memory_space<vmem>>, %arg2: memref<10x256xf32, #tpu.memory_space<vmem>>, %arg3: memref<8x256xf32, #tpu.memory_space<vmem>>) attributes {dimension_semantics = [#tpu.dimension_semantics<parallel>], iteration_bounds = array<i64: 1>, scalar_prefetch = 0 : i64, scratch_operands = 0 : i64, tpu.core_type = #tpu.core_type<tc>, window_params = [{transform_indices = @transform_0, window_bounds = array<i64: 8, 1>}, {pipeline_mode = #tpu.pipeline_mode<synchronous>, transform_indices = @transform_1, window_bounds = array<i64: 10, 256>}, {transform_indices = @transform_2, window_bounds = array<i64: 8, 256>}]} {
    %c0 = arith.constant 0 : index
    %c0_0 = arith.constant 0 : index
    %0 = vector.load %arg1[%c0, %c0_0] : memref<8x1xi32, #tpu.memory_space<vmem>>, vector<8x1xi32>
    %1 = tpu.iota {dimensions = array<i32: 1>} : vector<8x10xi32>
    %2 = vector.broadcast %0 : vector<8x1xi32> to vector<8x10xi32>
    %3 = arith.cmpi eq, %1, %2 : vector<8x10xi32>
    %4 = arith.extui %3 : vector<8x10xi1> to vector<8x10xi32>
    %5 = arith.sitofp %4 : vector<8x10xi32> to vector<8x10xf32>
    %c0_1 = arith.constant 0 : index
    %c0_2 = arith.constant 0 : index
    %6 = vector.load %arg2[%c0_1, %c0_2] : memref<10x256xf32, #tpu.memory_space<vmem>>, vector<10x256xf32>
    %cst = arith.constant dense<0.000000e+00> : vector<8x256xf32>
    %7 = tpu.matmul %5, %6, %cst {dimension_numbers = #tpu.dot_dimension_numbers<[1], [0], [0], [1], [0, 0, 1, 1], [], []>} : vector<8x10xf32>, vector<10x256xf32>, vector<8x256xf32> -> vector<8x256xf32>
    %c0_3 = arith.constant 0 : index
    %c0_4 = arith.constant 0 : index
    %8 = vector.load %arg3[%c0_3, %c0_4] : memref<8x256xf32, #tpu.memory_space<vmem>>, vector<8x256xf32>
    tpu.vector_store %arg3[%c0_3, %c0_4], %7 {strides = array<i32>} : memref<8x256xf32, #tpu.memory_space<vmem>>, vector<8x256xf32>,
    return
  }
  func.func @transform_0(%arg0: i32) -> (i32, i32) {
    %c0_i32 = arith.constant 0 : i32
    %c0_i32_0 = arith.constant 0 : i32
    return %arg0, %c0_i32 : i32, i32
  }
  func.func @transform_1(%arg0: i32) -> (i32, i32) {
    %c0_i32 = arith.constant 0 : i32
    %c0_i32_0 = arith.constant 0 : i32
    %c0_i32_1 = arith.constant 0 : i32
    return %c0_i32, %c0_i32_0 : i32, i32
  }
  func.func @transform_2(%arg0: i32) -> (i32, i32) {
    %c0_i32 = arith.constant 0 : i32
    %c0_i32_0 = arith.constant 0 : i32
    return %arg0, %c0_i32 : i32, i32
  }
}

</mosaic_0001>

<bundles_post_ra>
// kernel: tpu_custom_call.1
= control target key start
LH: loop header
LB: loop body
LE: loop exit
PB: predicated region body
PF: predicated region fallthrough
CT: control target
= control target key end

     0   :  { %7 = vsyncpa [#allocation3], 0  ;;  %s223_s0 = inlined_call_operand.vmem [shape: s32[8,1], index: 0, kind: input, shape index: {}]   ;;  %s224_s1 = inlined_call_operand.hbm [shape: f32[10,256], index: 1, kind: input, shape index: {}]   ;;  %s225_s2 = inlined_call_operand.hbm [shape: f32[8,256], index: 2, kind: output, shape index: {}]  }
   0x1   :  { %8 = vsyncpa [#allocation4], 0  ;;  %s193_s9 = smov [#allocation2]  }
   0x2   :  { %s16_s10 = sshll.u32 %s193_s9, 4  ;;  %s17_s10 = int_to_ptr.vmem [resolvable:$true] %s16_s10 }
   0x3   :  { %s157_s11 = scalar_lea.vmem %s17_s10, 512  ;;  %p162_p1 = scmp.lt.s32.totalorder %s17_s10, %s17_s10 }
   0x4   :  { %p158_p0 = scmp.ne.s32.totalorder %s17_s10, %s157_s11  ;;  %p163_p2 = scmp.lt.s32.totalorder %s157_s11, %s157_s11 }
   0x6   :  { %p164_p3 = por %p163_p2, %p162_p1 }
   0x8   :  { %p165_p4 = pnand %p164_p3, %p158_p0 }
   0xa   :  { %168 = shalt.err (!%p165_p4)
}
   0xb   :  { %s194_s12 = smov 256   ;;  %s195_s13 = smov 16  }
   0xc   :  { %22 = dma.hbm_to_vmem [thread:$0]  %s224_s1, 512, %s17_s10, [#allocation3], %s194_s12, %s194_s12, %s195_s13  }
   0xd   :  { %189 = dma.done.wait [#allocation3], 512  }
   0xe   :  { %190 = vsyncadd [#allocation3], 4294966784  ;;  %v196_v0 = vmov 0   ;;  %vm43_vm0 = vcmask 1041408   ;;  %v197_v1 = vmov 0.0   ;;  %v26_v2 = vld [vmem:[%s223_s0] sm:$0xff]  ;;  %v27_v7 = vlaneseq }
   0xf   :  { %148 = vset.pattern.permute.xlu0 %v196_v0  ;;  %114 = vmatprep.mubr.f32.mxu0 %v197_v1  ;;  %v38_v3 = vld [vmem:[#allocation2 + $0x18] sm:$0x3]  ;;  %v37_v4 = vld [vmem:[#allocation2 + $0x10] sm:$0x3]  ;;  %v36_v5 = vld [vmem:[#allocation2 + $0x8] sm:$0xff]  ;;  %vm39_vm1 = vcmask 80896  }
  0x10   :  { %30 = vperm.xlu0 %148, %v26_v2   ;;  %139 = vmatprep.subr.msk.mxu0 %vm43_vm0, %v38_v3  ;;  %v35_v6 = vld [vmem:[#allocation2] sm:$0xff]  ;;  %v28_v8 = vand.u32 127, %v27_v7  ;;  %s198_s1 = smov [#allocation5]  }
  0x11   :  { %140 = vmatpush1.msk.msra.mxu0 %vm43_vm0, %v37_v4  ;;  %s129_s18 = sshll.u32 %s198_s1, 4  ;;  %s130_s18 = int_to_ptr.vmem [resolvable:$true] %s129_s18 }
  0x12   :  { %80 = vmatprep.subr.mxu0 %v36_v5  ;;  %s169_s0 = scalar_lea.vmem %s130_s18, 256  ;;  %p174_p6 = scmp.lt.s32.totalorder %s130_s18, %s130_s18 }
  0x13   :  { %81 = vmatpush1.msra.mxu0 %v35_v6  ;;  %p170_p5 = scmp.ne.s32.totalorder %s130_s18, %s169_s0  ;;  %p175_p7 = scmp.lt.s32.totalorder %s169_s0, %s169_s0 }
  0x15   :  { %p176_p8 = por %p175_p7, %p174_p6 }
  0x17   :  { %p177_p9 = pnand %p176_p8, %p170_p5 }
  0x8b   :  { %v31_v9 = vpop.permute.xlu0 %30 }
  0x8c   :  { %vm32_vm2 = vcmp.eq.s32.totalorder %v28_v8, %v31_v9 }
  0x8d   :  { %v138_v10 = vsel %vm32_vm2, 1.0, %v197_v1 }
  0x8e   :  { %141 = vmatmul.mubr.msk.f32.vlgmr.msra.gmra.mxu0 %vm39_vm1, %v138_v10 }
 0x14e   :  { %v116_v11 = vpop.f32.mrf.mxu0 }
 0x14f   :  { %121 = vst [vmem:[#allocation5] sm:$0xff] %v116_v11 }
 0x150   :  { %v118_v12 = vpop.f32.mrf.mxu0 }
 0x151   :  { %122 = vst [vmem:[#allocation5 + $0x8] sm:$0xff] %v118_v12 }
 0x152   :  { %180 = shalt.err (!%p177_p9)
}
 0x153   :  { %132 = dma.vmem_to_hbm [thread:$0]  %s130_s18, 256, %s225_s2, [#allocation4]  }
 0x154   :  { %191 = dma.done.wait [#allocation4], 256  }
 0x155   :  { %192 = vsyncadd [#allocation4], 4294967040 }
 0x156   :  { %136 = vsyncpa [#allocation3], 1 }
 0x157   :  { %137 = vsyncpa [#allocation4], 1 }

</bundles_post_ra>
